<compile_context>
chip_gen: v7x
topology: tpu7x:2x2x1
jax: 0.10.0
libtpu: 0.0.40
codegen_flags: <defaults>
</compile_context>

<pallas_src>
import functools

import jax
import jax.numpy as jnp
from jax import lax
from jax.experimental import pallas as pl
from jax.experimental.pallas import tpu as pltpu


def _round_up(x, m):
    return (x + m - 1) // m * m


def _gather_kernel(idx_ref, table_hbm, out_ref, sem, *, num_valid_rows, n_inflight):
    """One token tile: out[t, :] = table[idx[t], :] via per-row HBM->VMEM DMAs.

    idx_ref   : SMEM (n_pad,)  int32    -- all token ids (scalar-prefetched)
    table_hbm : HBM  (V2, D)   float32  -- full embedding table, never copied to VMEM
    out_ref   : VMEM (tile, D) float32  -- gathered rows for this tile
    sem       : DMA semaphores, one per in-flight copy slot
    """
    tile = out_ref.shape[0]
    base = pl.program_id(0) * tile

    def row_copy(src_row, dst_row, slot):
        return pltpu.make_async_copy(
            table_hbm.at[pl.ds(src_row, 1), :],
            out_ref.at[pl.ds(dst_row, 1), :],
            sem.at[slot],
        )

    def body(t, carry):
        slot = lax.rem(t, n_inflight)

        # Keep at most `n_inflight` copies outstanding: before reusing a slot, wait
        # for the copy that previously used it (all row copies have identical size,
        # so the wait descriptor's byte count matches).
        @pl.when(t >= n_inflight)
        def _():
            row_copy(0, 0, slot).wait()

        tok = idx_ref[base + t]
        tok = jnp.clip(tok, 0, num_valid_rows - 1)   # never DMA out of bounds
        row_copy(tok, t, slot).start()
        return carry

    lax.fori_loop(0, tile, body, 0)

    # Drain: the wrapper guarantees tile >= n_inflight, so every slot has exactly
    # one outstanding copy here.
    for slot in range(n_inflight):
        row_copy(0, 0, slot).wait()


def glove_embedding_forward(layer_matrix, idx, *, tokens_per_tile=1024, max_in_flight=8):
    """Pallas embedding lookup: out[b, s, :] = layer_matrix[idx[b, s], :]."""
    B, S = idx.shape
    V2, D = layer_matrix.shape
    n_tokens = B * S

    # Tile sizing: sublane-aligned; large enough to amortize per-grid-step overhead,
    # small enough to always give >= 2 grid steps (feeds both TensorCores on v7x).
    half = (n_tokens + 1) // 2
    tile = max(8, min(_round_up(tokens_per_tile, 8), _round_up(half, 8)))
    n_pad = _round_up(n_tokens, tile)
    num_tiles = n_pad // tile

    # Padded ids select row 0 (UNK); the corresponding output rows are sliced off below.
    idx_flat = jnp.pad(idx.reshape(-1).astype(jnp.int32), (0, n_pad - n_tokens))

    n_inflight = min(max_in_flight, tile)   # tile is a multiple of 8 >= 8

    # TODO(synk): for very large B*S the flat id array in SMEM may exceed SMEM capacity;
    # switch ids to a per-tile blocked SMEM input instead of a single scalar-prefetch array.
    grid_spec = pltpu.PrefetchScalarGridSpec(
        num_scalar_prefetch=1,                          # token ids -> SMEM
        grid=(num_tiles,),
        in_specs=[pl.BlockSpec(memory_space=pl.ANY)],   # table stays in HBM, no auto-DMA
        out_specs=pl.BlockSpec((tile, D), lambda i, ids: (i, 0)),   # lane/sublane-dense
        scratch_shapes=[pltpu.SemaphoreType.DMA((n_inflight,))],
    )

    out_flat = pl.pallas_call(
        functools.partial(_gather_kernel, num_valid_rows=V2, n_inflight=n_inflight),
        out_shape=jax.ShapeDtypeStruct((n_pad, D), layer_matrix.dtype),
        grid_spec=grid_spec,
        compiler_params=pltpu.CompilerParams(
            dimension_semantics=("parallel",),          # independent token tiles
        ),
    )(idx_flat, layer_matrix)

    return out_flat[:n_tokens].reshape(B, S, D)


def build_layer_matrix(embedding_tensor):
    """Mirror Glove_Embedding_Layer.__init__ parameter construction."""
    D = embedding_tensor.shape[1]
    unk_parameter = jnp.zeros((1, D), dtype=jnp.float32)   # trainable in torch (forward: zeros)
    pad_tensor = jnp.zeros((1, D), dtype=jnp.float32)      # frozen in torch
    return jnp.concatenate(
        [unk_parameter, pad_tensor, embedding_tensor.astype(jnp.float32)], axis=0)


if __name__ == "__main__":
    # Small deterministic shapes: vocab V=50, emb dim D=128, batch B=2, seq S=8.
    V, D = 50, 128
    B, S = 2, 8

    key = jax.random.PRNGKey(0)
    k_emb, k_idx, k_idx2 = jax.random.split(key, 3)

    embedding_tensor = jax.random.normal(k_emb, (V, D), dtype=jnp.float32)
    layer_matrix = build_layer_matrix(embedding_tensor)        # (V+2, D)

    # Token ids in [0, V+2): 0 = UNK, 1 = PAD, 2.. = vocab rows.
    idx = jax.random.randint(k_idx, (B, S), 0, V + 2, dtype=jnp.int32)
    out = jax.block_until_ready(glove_embedding_forward(layer_matrix, idx))

    ref = jnp.take(layer_matrix, idx, axis=0)                  # pure-JAX reference
    assert out.shape == (B, S, D)
    assert jnp.array_equal(out, ref), "Pallas embedding gather mismatch (small)"

    # Second shape: larger token count exercising a full DMA ring (tile=128, 8 in flight).
    B2, S2 = 4, 64
    idx2 = jax.random.randint(k_idx2, (B2, S2), 0, V + 2, dtype=jnp.int32)
    out2 = jax.block_until_ready(glove_embedding_forward(layer_matrix, idx2))
    ref2 = jnp.take(layer_matrix, idx2, axis=0)
    assert jnp.array_equal(out2, ref2), "Pallas embedding gather mismatch (multi-tile)"

    print("KERNEL_OK")
</pallas_src>

<mosaic_0001>
module attributes {stable_mosaic.version = 11 : i64} {
  func.func @_gather_kernel(%arg0: i32, %arg1: memref<16xi32, #tpu.memory_space<smem>>, %arg2: memref<52x128xf32, #tpu.memory_space<any>>, %arg3: memref<8x128xf32, #tpu.memory_space<vmem>>, %arg4: memref<8x!tpu.dma_semaphore, #tpu.memory_space<semaphore_mem>>) attributes {dimension_semantics = [#tpu.dimension_semantics<parallel>], iteration_bounds = array<i64: 2>, scalar_prefetch = 1 : i64, scratch_operands = 1 : i64, tpu.core_type = #tpu.core_type<tc>, window_params = [{}, {transform_indices = @transform_1, window_bounds = array<i64: 8, 128>}]} {
    %c8_i32 = arith.constant 8 : i32
    %0 = arith.muli %arg0, %c8_i32 : i32
    %c0_i32 = arith.constant 0 : i32
    %c8_i32_0 = arith.constant 8 : i32
    %1 = arith.addi %c0_i32, %c8_i32_0 : i32
    %c1_i32 = arith.constant 1 : i32
    scf.for %arg5 = %c0_i32 to %1 step %c1_i32  : i32 {
      %c8_i32_36 = arith.constant 8 : i32
      %34 = arith.remsi %arg5, %c8_i32_36 : i32
      %c8_i32_37 = arith.constant 8 : i32
      %35 = arith.cmpi sge, %arg5, %c8_i32_37 : i32
      %36 = arith.extui %35 : i1 to i32
      %c0_i32_38 = arith.constant 0 : i32
      %37 = arith.cmpi ne, %36, %c0_i32_38 : i32
      scf.if %37 {
        %c0_i32_42 = arith.constant 0 : i32
        %c0_i32_43 = arith.constant 0 : i32
        %47 = tpu.memref_slice %arg2[%c0_i32_42, %c0_i32_43] : memref<52x128xf32, #tpu.memory_space<any>> -> memref<1x128xf32, #tpu.memory_space<any>>
        %c0_i32_44 = arith.constant 0 : i32
        %c0_i32_45 = arith.constant 0 : i32
        %48 = tpu.memref_slice %arg3[%c0_i32_44, %c0_i32_45] : memref<8x128xf32, #tpu.memory_space<vmem>> -> memref<1x128xf32, #tpu.memory_space<vmem>>
        %49 = tpu.memref_slice %arg4[%34] : memref<8x!tpu.dma_semaphore, #tpu.memory_space<semaphore_mem>> -> memref<1x!tpu.dma_semaphore, #tpu.memory_space<semaphore_mem>>
        %50 = tpu.memref_squeeze %49 : memref<1x!tpu.dma_semaphore, #tpu.memory_space<semaphore_mem>> -> memref<!tpu.dma_semaphore, #tpu.memory_space<semaphore_mem>>
        tpu.wait_dma2 semaphore(%50 : memref<!tpu.dma_semaphore, #tpu.memory_space<semaphore_mem>>) src(%47 : memref<1x128xf32, #tpu.memory_space<any>>) dst(%48 : memref<1x128xf32, #tpu.memory_space<vmem>>)
      } else {
      }
      %38 = arith.addi %0, %arg5 : i32
      %39 = arith.index_cast %38 : i32 to index
      %40 = memref.load %arg1[%39] : memref<16xi32, #tpu.memory_space<smem>>
      %c0_i32_39 = arith.constant 0 : i32
      %c51_i32 = arith.constant 51 : i32
      %41 = arith.maxsi %c0_i32_39, %40 : i32
      %42 = arith.minsi %c51_i32, %41 : i32
      %c0_i32_40 = arith.constant 0 : i32
      %43 = tpu.memref_slice %arg2[%42, %c0_i32_40] : memref<52x128xf32, #tpu.memory_space<any>> -> memref<1x128xf32, #tpu.memory_space<any>>
      %c0_i32_41 = arith.constant 0 : i32
      %44 = tpu.memref_slice %arg3[%arg5, %c0_i32_41] : memref<8x128xf32, #tpu.memory_space<vmem>> -> memref<1x128xf32, #tpu.memory_space<vmem>>
      %45 = tpu.memref_slice %arg4[%34] : memref<8x!tpu.dma_semaphore, #tpu.memory_space<semaphore_mem>> -> memref<1x!tpu.dma_semaphore, #tpu.memory_space<semaphore_mem>>
      %46 = tpu.memref_squeeze %45 : memref<1x!tpu.dma_semaphore, #tpu.memory_space<semaphore_mem>> -> memref<!tpu.dma_semaphore, #tpu.memory_space<semaphore_mem>>
      tpu.enqueue_dma source(%43 : memref<1x128xf32, #tpu.memory_space<any>>) target(%44 : memref<1x128xf32, #tpu.memory_space<vmem>>) target_semaphore(%46 : memref<!tpu.dma_semaphore, #tpu.memory_space<semaphore_mem>>)
    }
    %c8_i32_1 = arith.constant 8 : i32
    %c0_i32_2 = arith.constant 0 : i32
    %c0_i32_3 = arith.constant 0 : i32
    %c0_i32_4 = arith.constant 0 : i32
    %2 = tpu.memref_slice %arg2[%c0_i32_3, %c0_i32_4] : memref<52x128xf32, #tpu.memory_space<any>> -> memref<1x128xf32, #tpu.memory_space<any>>
    %c0_i32_5 = arith.constant 0 : i32
    %c0_i32_6 = arith.constant 0 : i32
    %3 = tpu.memref_slice %arg3[%c0_i32_5, %c0_i32_6] : memref<8x128xf32, #tpu.memory_space<vmem>> -> memref<1x128xf32, #tpu.memory_space<vmem>>
    %4 = tpu.memref_slice %arg4[%c0_i32_2] : memref<8x!tpu.dma_semaphore, #tpu.memory_space<semaphore_mem>> -> memref<1x!tpu.dma_semaphore, #tpu.memory_space<semaphore_mem>>
    %5 = tpu.memref_squeeze %4 : memref<1x!tpu.dma_semaphore, #tpu.memory_space<semaphore_mem>> -> memref<!tpu.dma_semaphore, #tpu.memory_space<semaphore_mem>>
    tpu.wait_dma2 semaphore(%5 : memref<!tpu.dma_semaphore, #tpu.memory_space<semaphore_mem>>) src(%2 : memref<1x128xf32, #tpu.memory_space<any>>) dst(%3 : memref<1x128xf32, #tpu.memory_space<vmem>>)
    %c1_i32_7 = arith.constant 1 : i32
    %c0_i32_8 = arith.constant 0 : i32
    %c0_i32_9 = arith.constant 0 : i32
    %6 = tpu.memref_slice %arg2[%c0_i32_8, %c0_i32_9] : memref<52x128xf32, #tpu.memory_space<any>> -> memref<1x128xf32, #tpu.memory_space<any>>
    %c0_i32_10 = arith.constant 0 : i32
    %c0_i32_11 = arith.constant 0 : i32
    %7 = tpu.memref_slice %arg3[%c0_i32_10, %c0_i32_11] : memref<8x128xf32, #tpu.memory_space<vmem>> -> memref<1x128xf32, #tpu.memory_space<vmem>>
    %8 = tpu.memref_slice %arg4[%c1_i32_7] : memref<8x!tpu.dma_semaphore, #tpu.memory_space<semaphore_mem>> -> memref<1x!tpu.dma_semaphore, #tpu.memory_space<semaphore_mem>>
    %9 = tpu.memref_squeeze %8 : memref<1x!tpu.dma_semaphore, #tpu.memory_space<semaphore_mem>> -> memref<!tpu.dma_semaphore, #tpu.memory_space<semaphore_mem>>
    tpu.wait_dma2 semaphore(%9 : memref<!tpu.dma_semaphore, #tpu.memory_space<semaphore_mem>>) src(%6 : memref<1x128xf32, #tpu.memory_space<any>>) dst(%7 : memref<1x128xf32, #tpu.memory_space<vmem>>)
    %c2_i32 = arith.constant 2 : i32
    %c0_i32_12 = arith.constant 0 : i32
    %c0_i32_13 = arith.constant 0 : i32
    %10 = tpu.memref_slice %arg2[%c0_i32_12, %c0_i32_13] : memref<52x128xf32, #tpu.memory_space<any>> -> memref<1x128xf32, #tpu.memory_space<any>>
    %c0_i32_14 = arith.constant 0 : i32
    %c0_i32_15 = arith.constant 0 : i32
    %11 = tpu.memref_slice %arg3[%c0_i32_14, %c0_i32_15] : memref<8x128xf32, #tpu.memory_space<vmem>> -> memref<1x128xf32, #tpu.memory_space<vmem>>
    %12 = tpu.memref_slice %arg4[%c2_i32] : memref<8x!tpu.dma_semaphore, #tpu.memory_space<semaphore_mem>> -> memref<1x!tpu.dma_semaphore, #tpu.memory_space<semaphore_mem>>
    %13 = tpu.memref_squeeze %12 : memref<1x!tpu.dma_semaphore, #tpu.memory_space<semaphore_mem>> -> memref<!tpu.dma_semaphore, #tpu.memory_space<semaphore_mem>>
    tpu.wait_dma2 semaphore(%13 : memref<!tpu.dma_semaphore, #tpu.memory_space<semaphore_mem>>) src(%10 : memref<1x128xf32, #tpu.memory_space<any>>) dst(%11 : memref<1x128xf32, #tpu.memory_space<vmem>>)
    %c3_i32 = arith.constant 3 : i32
    %c0_i32_16 = arith.constant 0 : i32
    %c0_i32_17 = arith.constant 0 : i32
    %14 = tpu.memref_slice %arg2[%c0_i32_16, %c0_i32_17] : memref<52x128xf32, #tpu.memory_space<any>> -> memref<1x128xf32, #tpu.memory_space<any>>
    %c0_i32_18 = arith.constant 0 : i32
    %c0_i32_19 = arith.constant 0 : i32
    %15 = tpu.memref_slice %arg3[%c0_i32_18, %c0_i32_19] : memref<8x128xf32, #tpu.memory_space<vmem>> -> memref<1x128xf32, #tpu.memory_space<vmem>>
    %16 = tpu.memref_slice %arg4[%c3_i32] : memref<8x!tpu.dma_semaphore, #tpu.memory_space<semaphore_mem>> -> memref<1x!tpu.dma_semaphore, #tpu.memory_space<semaphore_mem>>
    %17 = tpu.memref_squeeze %16 : memref<1x!tpu.dma_semaphore, #tpu.memory_space<semaphore_mem>> -> memref<!tpu.dma_semaphore, #tpu.memory_space<semaphore_mem>>
    tpu.wait_dma2 semaphore(%17 : memref<!tpu.dma_semaphore, #tpu.memory_space<semaphore_mem>>) src(%14 : memref<1x128xf32, #tpu.memory_space<any>>) dst(%15 : memref<1x128xf32, #tpu.memory_space<vmem>>)
    %c4_i32 = arith.constant 4 : i32
    %c0_i32_20 = arith.constant 0 : i32
    %c0_i32_21 = arith.constant 0 : i32
    %18 = tpu.memref_slice %arg2[%c0_i32_20, %c0_i32_21] : memref<52x128xf32, #tpu.memory_space<any>> -> memref<1x128xf32, #tpu.memory_space<any>>
    %c0_i32_22 = arith.constant 0 : i32
    %c0_i32_23 = arith.constant 0 : i32
    %19 = tpu.memref_slice %arg3[%c0_i32_22, %c0_i32_23] : memref<8x128xf32, #tpu.memory_space<vmem>> -> memref<1x128xf32, #tpu.memory_space<vmem>>
    %20 = tpu.memref_slice %arg4[%c4_i32] : memref<8x!tpu.dma_semaphore, #tpu.memory_space<semaphore_mem>> -> memref<1x!tpu.dma_semaphore, #tpu.memory_space<semaphore_mem>>
    %21 = tpu.memref_squeeze %20 : memref<1x!tpu.dma_semaphore, #tpu.memory_space<semaphore_mem>> -> memref<!tpu.dma_semaphore, #tpu.memory_space<semaphore_mem>>
    tpu.wait_dma2 semaphore(%21 : memref<!tpu.dma_semaphore, #tpu.memory_space<semaphore_mem>>) src(%18 : memref<1x128xf32, #tpu.memory_space<any>>) dst(%19 : memref<1x128xf32, #tpu.memory_space<vmem>>)
    %c5_i32 = arith.constant 5 : i32
    %c0_i32_24 = arith.constant 0 : i32
    %c0_i32_25 = arith.constant 0 : i32
    %22 = tpu.memref_slice %arg2[%c0_i32_24, %c0_i32_25] : memref<52x128xf32, #tpu.memory_space<any>> -> memref<1x128xf32, #tpu.memory_space<any>>
    %c0_i32_26 = arith.constant 0 : i32
    %c0_i32_27 = arith.constant 0 : i32
    %23 = tpu.memref_slice %arg3[%c0_i32_26, %c0_i32_27] : memref<8x128xf32, #tpu.memory_space<vmem>> -> memref<1x128xf32, #tpu.memory_space<vmem>>
    %24 = tpu.memref_slice %arg4[%c5_i32] : memref<8x!tpu.dma_semaphore, #tpu.memory_space<semaphore_mem>> -> memref<1x!tpu.dma_semaphore, #tpu.memory_space<semaphore_mem>>
    %25 = tpu.memref_squeeze %24 : memref<1x!tpu.dma_semaphore, #tpu.memory_space<semaphore_mem>> -> memref<!tpu.dma_semaphore, #tpu.memory_space<semaphore_mem>>
    tpu.wait_dma2 semaphore(%25 : memref<!tpu.dma_semaphore, #tpu.memory_space<semaphore_mem>>) src(%22 : memref<1x128xf32, #tpu.memory_space<any>>) dst(%23 : memref<1x128xf32, #tpu.memory_space<vmem>>)
    %c6_i32 = arith.constant 6 : i32
    %c0_i32_28 = arith.constant 0 : i32
    %c0_i32_29 = arith.constant 0 : i32
    %26 = tpu.memref_slice %arg2[%c0_i32_28, %c0_i32_29] : memref<52x128xf32, #tpu.memory_space<any>> -> memref<1x128xf32, #tpu.memory_space<any>>
    %c0_i32_30 = arith.constant 0 : i32
    %c0_i32_31 = arith.constant 0 : i32
    %27 = tpu.memref_slice %arg3[%c0_i32_30, %c0_i32_31] : memref<8x128xf32, #tpu.memory_space<vmem>> -> memref<1x128xf32, #tpu.memory_space<vmem>>
    %28 = tpu.memref_slice %arg4[%c6_i32] : memref<8x!tpu.dma_semaphore, #tpu.memory_space<semaphore_mem>> -> memref<1x!tpu.dma_semaphore, #tpu.memory_space<semaphore_mem>>
    %29 = tpu.memref_squeeze %28 : memref<1x!tpu.dma_semaphore, #tpu.memory_space<semaphore_mem>> -> memref<!tpu.dma_semaphore, #tpu.memory_space<semaphore_mem>>
    tpu.wait_dma2 semaphore(%29 : memref<!tpu.dma_semaphore, #tpu.memory_space<semaphore_mem>>) src(%26 : memref<1x128xf32, #tpu.memory_space<any>>) dst(%27 : memref<1x128xf32, #tpu.memory_space<vmem>>)
    %c7_i32 = arith.constant 7 : i32
    %c0_i32_32 = arith.constant 0 : i32
    %c0_i32_33 = arith.constant 0 : i32
    %30 = tpu.memref_slice %arg2[%c0_i32_32, %c0_i32_33] : memref<52x128xf32, #tpu.memory_space<any>> -> memref<1x128xf32, #tpu.memory_space<any>>
    %c0_i32_34 = arith.constant 0 : i32
    %c0_i32_35 = arith.constant 0 : i32
    %31 = tpu.memref_slice %arg3[%c0_i32_34, %c0_i32_35] : memref<8x128xf32, #tpu.memory_space<vmem>> -> memref<1x128xf32, #tpu.memory_space<vmem>>
    %32 = tpu.memref_slice %arg4[%c7_i32] : memref<8x!tpu.dma_semaphore, #tpu.memory_space<semaphore_mem>> -> memref<1x!tpu.dma_semaphore, #tpu.memory_space<semaphore_mem>>
    %33 = tpu.memref_squeeze %32 : memref<1x!tpu.dma_semaphore, #tpu.memory_space<semaphore_mem>> -> memref<!tpu.dma_semaphore, #tpu.memory_space<semaphore_mem>>
    tpu.wait_dma2 semaphore(%33 : memref<!tpu.dma_semaphore, #tpu.memory_space<semaphore_mem>>) src(%30 : memref<1x128xf32, #tpu.memory_space<any>>) dst(%31 : memref<1x128xf32, #tpu.memory_space<vmem>>)
    return
  }
  func.func @transform_1(%arg0: i32, %arg1: memref<16xi32, #tpu.memory_space<smem>>) -> (i32, i32) {
    %c0_i32 = arith.constant 0 : i32
    %c0_i32_0 = arith.constant 0 : i32
    return %arg0, %c0_i32 : i32, i32
  }
}

</mosaic_0001>

<bundles_post_ra>
// kernel: tpu_custom_call.1
= control target key start
LH: loop header
LB: loop body
LE: loop exit
PB: predicated region body
PF: predicated region fallthrough
CT: control target
= control target key end

     0   :  { %s578_s0 = inlined_call_operand.hbm [shape: s32[16], index: 0, kind: input, shape index: {}]   ;;  %s579_s1 = inlined_call_operand.hbm [shape: f32[52,128], index: 1, kind: input, shape index: {}]   ;;  %s580_s2 = inlined_call_operand.hbm [shape: f32[16,128], index: 2, kind: output, shape index: {}]  }
   0x1   :  { %s310_s11 = scalar_lea.hbm %s578_s0, 16 }
   0x2   :  { %p311_p0 = scmp.ne.s32.totalorder %s578_s0, %s310_s11  ;;  %p314_p1 = scmp.lt.u32.totalorder %s310_s11, %s578_s0 }
   0x4   :  { %p316_p2 = pnand %p314_p1, %p311_p0 }
   0x6   :  { %319 = shalt.err (!%p316_p2)  }
   0x7   :  { %s430_s16 = smov [#allocation4]  }
   0x8   :  { %8 = dma.hbm_to_smem %s578_s0, 16, %s430_s16, [#allocation3] }
   0x9   :  { %388 = dma.done.wait [#allocation3], 16 }
   0xa   :  { %389 = vsyncadd [#allocation3], 4294967280 }
   0xb   :  { %10 = sfence }
   0xc   :  { %11 = vsyncpa [#allocation6], 0 }
   0xd   :  { %13 = vsyncpa [#allocation6 + $0x1], 0  ;;  %s459_s19 = smov 0   ;;  %s461_s20 = smov 0  }
   0xe   :  { %s463_s21 = smov 0  }
   0xf LB: > { %s240_s0 = sadd.s32 4294967295, %s424_s21   ;;  %s476_s22 = sadd.s32 1, %s424_s21   ;;  %s424_s21 = sphi %s463_s21, %s585_s21   ;;  %s420_s20 = sphi %s461_s20, %s584_s20   ;;  %s416_s19 = sphi %s459_s19, %s583_s19  }
  0x10   : > { %s22_s23 = ssub.s32 %s424_s21, %s476_s22  ;;  %s25_s24 = sadd.s32 1, %s420_s20 }
  0x11   : > { %p23_p3 = scmp.eq.s32.totalorder %s22_s23, 0  ;;  %p241_p4 = scmp.ne.s32.totalorder %s22_s23, 0 }
  0x12   : > { %p29_p5 = scmp.eq.s32.totalorder %s424_s21, 1  ;;  %p34_p6 = scmp.ne.s32.totalorder %s420_s20, %s416_s19 }
  0x13   : > { %s485_s25 = scalar_select %p23_p3, %s420_s20, %s25_s24  }
  0x14   : > { %p487_p7 = por %p241_p4, %p29_p5  ;;  %p35_p8 = scmp.eq.s32.totalorder %s240_s0, 1 }
  0x15   : > { %p242_p10 = scmp.ge.s32.totalorder %s424_s21, 2 }
  0x16   : > { %p491_p9 = por %p35_p8, %p34_p6  ;;  %s49_s28 = sand.u32 (!%p242_p10), 1, %s420_s20  }
  0x17   : > { %44 = sbr.rel (%p242_p10) target bundleno = 120 (0x78), region = 12  ;;  %s244_s29 = sshll.u32 (!%p242_p10), %s424_s21, 3 }
  0x18   : > { %s500_s30 = sshll.u32 (!%p242_p10), %s49_s28, 3  ;;  %s503_s4 = smov (!%p242_p10), 0  }
  0x19   : > { %s51_s3 = scalar_lea.vmem (!%p242_p10), [#allocation5], %s500_s30 }
  0x1e LB: >> { %p59_p11 = scmp.lt.s32.totalorder %s428_s4, 0  ;;  %s60_s5 = ssub.s32 0, %s428_s4  ;;  %s428_s4 = sphi %s503_s4, %s58_s4  }
  0x1f   : >> { %s245_s6 = smin.u32 %s428_s4, %s60_s5  ;;  %p275_p12 = scmp.ge.s32.totalorder %s428_s4, 8 }
  0x20   : >> { %s62_s7 = sand.u32 7, %s245_s6  }
  0x21   : >> { %s63_s8 = ssub.s32 0, %s62_s7 }
  0x22   : >> { %s587_s8 = smov (!%p59_p11, %s63_s8), %s62_s7 }
  0x23   : >> { %s512_s9 = scalar_lea.sflag [#allocation2], %s587_s8 }
  0x24   : >> { %391 = dma.done.wait (%p275_p12), %s512_s9, 16 }
  0x25   : >> { %393 = vsyncadd (%p275_p12), %s512_s9, 4294967280  ;;  %s73_s10 = sadd.s32 %s428_s4, %s244_s29  ;;  %s81_s12 = scalar_lea.vmem %s51_s3, %s428_s4 [#allocation5] }
  0x26   : >> { %s74_s11 = sld [smem:[#allocation4 + %s73_s10]]  ;;  %s90_s13 = sshll.u32 %s81_s12, 4  ;;  %s91_s13 = int_to_ptr.vmem [resolvable:$true] %s90_s13 }
  0x27   : >> { %s322_s24 = scalar_lea.hbm %s579_s1, 896 }
  0x2c   : >> { %p75_p13 = scmp.gt.s32.totalorder %s74_s11, 0  ;;  %p247_p0 = scmp.lt.s32.totalorder %s74_s11, 51 }
  0x2e   : >> { %s589_s11 = smov (!%p75_p13, %s74_s11), 0 }
  0x2f   : >> { %s591_s11 = smov (!%p247_p0, %s589_s11), 51 }
  0x30   : >> { %s252_s14 = sshll.u32 %s591_s11, 4 }
  0x31   : >> { %s80_s17 = scalar_lea.hbm %s579_s1, %s252_s14 }
  0x32   : >> { %s320_s18 = scalar_lea.hbm %s80_s17, 16  ;;  %p323_p2 = scmp.lt.u32.totalorder %s80_s17, %s579_s1 }
  0x33   : >> { %p321_p1 = scmp.ne.s32.totalorder %s80_s17, %s320_s18  ;;  %p324_p3 = scmp.lt.u32.totalorder %s322_s24, %s320_s18 }
  0x34   : >> { %p326_p5 = scmp.lt.u32.totalorder %s320_s18, %s80_s17 }
  0x35   : >> { %p325_p4 = por %p324_p3, %p323_p2 }
  0x37   : >> { %p327_p6 = por %p326_p5, %p325_p4 }
  0x39   : >> { %p328_p8 = pnand %p327_p6, %p321_p1 }
  0x3b   : >> { %331 = shalt.err (!%p328_p8)  }
  0x3c   : >> { %s332_s7 = scalar_lea.vmem %s91_s13, 16  ;;  %s431_s8 = smov [#allocation5]  }
  0x3d   : >> { %p333_p10 = scmp.ne.s32.totalorder %s91_s13, %s332_s7  ;;  %s334_s10 = sshll.u32 %s431_s8, 4  ;;  %s531_s10 = int_to_ptr.vmem [resolvable:$false] %s334_s10 }
  0x3e   : >> { %s336_s11 = scalar_lea.vmem %s531_s10, 256  ;;  %p337_p11 = scmp.lt.s32.totalorder %s91_s13, %s531_s10 }
  0x3f   : >> { %p338_p12 = scmp.lt.s32.totalorder %s336_s11, %s332_s7 }
  0x41   : >> { %p339_p13 = por %p338_p12, %p337_p11 }
  0x43   : >> { %p340_p0 = pnand %p339_p13, %p333_p10 }
  0x45   : >> { %343 = shalt.err (!%p340_p0)  }
  0x46   : >> { %93 = dma.hbm_to_vmem [thread:$0]  %s80_s17, 16, %s91_s13, %s512_s9 }
  0x47   : >> { %s58_s4 = sadd.s32 1, %s428_s4  }
  0x48   : >> { %p55_p1 = scmp.ge.s32.totalorder %s58_s4, 8  }
  0x4a   : > { %57 = sbr.rel (!%p55_p1) target bundleno = 30 (0x1e), region = 77 }
  0x51   : > { %394 = dma.done.wait [#allocation2], 16 }
  0x52   : > { %395 = vsyncadd [#allocation2], 4294967280 }
  0x53   : > { %396 = dma.done.wait [#allocation2 + $0x1], 16 }
  0x54   : > { %397 = vsyncadd [#allocation2 + $0x1], 4294967280 }
  0x55   : > { %398 = dma.done.wait [#allocation2 + $0x2], 16 }
  0x56   : > { %399 = vsyncadd [#allocation2 + $0x2], 4294967280 }
  0x57   : > { %400 = dma.done.wait [#allocation2 + $0x3], 16 }
  0x58   : > { %401 = vsyncadd [#allocation2 + $0x3], 4294967280 }
  0x59   : > { %402 = dma.done.wait [#allocation2 + $0x4], 16 }
  0x5a   : > { %403 = vsyncadd [#allocation2 + $0x4], 4294967280 }
  0x5b   : > { %404 = dma.done.wait [#allocation2 + $0x5], 16 }
  0x5c   : > { %405 = vsyncadd [#allocation2 + $0x5], 4294967280 }
  0x5d   : > { %406 = dma.done.wait [#allocation2 + $0x6], 16 }
  0x5e   : > { %407 = vsyncadd [#allocation2 + $0x6], 4294967280 }
  0x5f   : > { %408 = dma.done.wait [#allocation2 + $0x7], 16 }
  0x60   : > { %409 = vsyncadd [#allocation2 + $0x7], 4294967280  ;;  %s254_s29 = sshll.u32 %s424_s21, 7  ;;  %s132_s13 = sshll.u32 %s51_s3, 4  ;;  %s133_s13 = int_to_ptr.vmem [resolvable:$true] %s132_s13 }
  0x61   : > { %s130_s12 = scalar_lea.hbm %s580_s2, %s254_s29  ;;  %s119_s14 = scalar_lea.sflag [#allocation6], %s49_s28 }
  0x62   : > { %s344_s15 = scalar_lea.vmem %s133_s13, 128  ;;  %p351_p5 = scmp.lt.s32.totalorder %s133_s13, %s531_s10 }
  0x63   : > { %p345_p2 = scmp.ne.s32.totalorder %s133_s13, %s344_s15  ;;  %p352_p6 = scmp.lt.s32.totalorder %s336_s11, %s344_s15 }
  0x65   : > { %p346_p3 = pnand %p345_p2, %p487_p7  ;;  %p353_p8 = por %p352_p6, %p351_p5 }
  0x67   : > { %p347_p4 = pneg %p346_p3 }
  0x69   : > { %p354_p10 = pnand %p353_p8, %p347_p4 }
  0x6b   : > { %357 = shalt.err (!%p354_p10)
}
  0x6c   : > { %s358_s16 = scalar_lea.hbm %s130_s12, 128  ;;  %s362_s28 = scalar_lea.hbm %s580_s2, 256 }
  0x6d   : > { %p359_p11 = scmp.ne.s32.totalorder %s130_s12, %s358_s16  ;;  %p363_p0 = scmp.lt.u32.totalorder %s130_s12, %s580_s2 }
  0x6e   : > { %p364_p1 = scmp.lt.u32.totalorder %s362_s28, %s358_s16  ;;  %p366_p3 = scmp.lt.u32.totalorder %s358_s16, %s130_s12 }
  0x6f   : > { %p360_p12 = pnand %p359_p11, %p487_p7 }
  0x70   : > { %p365_p2 = por %p364_p1, %p363_p0 }
  0x71   : > { %p361_p13 = pneg %p360_p12 }
  0x72   : > { %p367_p5 = por %p366_p3, %p365_p2 }
  0x74   : > { %p368_p4 = pnand %p367_p5, %p361_p13 }
  0x76   : > { %371 = shalt.err (!%p368_p4)
}
  0x77   : > { %269 = dma.vmem_to_hbm [thread:$0]  (%p487_p7), %s133_s13, 128, %s130_s12, %s119_s14  }
  0x78 PF: > { %p276_p6 = scmp.ge.s32.totalorder %s424_s21, 1  ;;  %s144_s0 = sand.u32 1, %s416_s19  }
  0x79   : > { %s145_s23 = scalar_lea.sflag [#allocation6], %s144_s0 }
  0x7a   : > { %p272_p8 = pnand %p276_p6, %p491_p9 }
  0x7c   : > { %411 = dma.done.wait (!%p272_p8), %s145_s23, 128  }
  0x7d   : > { %413 = vsyncadd (!%p272_p8), %s145_s23, 4294967168  ;;  %p16_p10 = scmp.ge.s32.totalorder %s476_s22, 3   ;;  %s583_s19 = smov %s420_s20 }
  0x7e   : > { %s584_s20 = smov %s485_s25  ;;  %s585_s21 = smov %s476_s22 }
  0x7f   :  { %18 = sbr.rel (!%p16_p10) target bundleno = 15 (0xf), region = 88 }
  0x86   :  { %150 = vsyncpa [#allocation6], 1 }
  0x87   :  { %152 = vsyncpa [#allocation6 + $0x1], 1 }
  0x88   :  { %153 = vsyncmov [#allocation2] }
  0x8b   :  { %s154_s21 = vpop.sfrf %153 }
  0x8c   :  { %p257_p7 = scmp.ne.s32.totalorder %s154_s21, 0 }
  0x8e   :  { %158 = shalt.err (%p257_p7)  }
  0x8f   :  { %160 = vsyncmov [#allocation2 + $0x1] }
  0x92   :  { %s161_s26 = vpop.sfrf %160 }
  0x93   :  { %p258_p9 = scmp.ne.s32.totalorder %s161_s26, 0 }
  0x95   :  { %165 = shalt.err (%p258_p9)  }
  0x96   :  { %167 = vsyncmov [#allocation2 + $0x2] }
  0x99   :  { %s168_s27 = vpop.sfrf %167 }
  0x9a   :  { %p259_p11 = scmp.ne.s32.totalorder %s168_s27, 0 }
  0x9c   :  { %172 = shalt.err (%p259_p11)  }
  0x9d   :  { %174 = vsyncmov [#allocation2 + $0x3] }
  0xa0   :  { %s175_s24 = vpop.sfrf %174 }
  0xa1   :  { %p260_p12 = scmp.ne.s32.totalorder %s175_s24, 0 }
  0xa3   :  { %179 = shalt.err (%p260_p12)  }
  0xa4   :  { %181 = vsyncmov [#allocation2 + $0x4] }
  0xa7   :  { %s182_s22 = vpop.sfrf %181 }
  0xa8   :  { %p261_p13 = scmp.ne.s32.totalorder %s182_s22, 0 }
  0xaa   :  { %186 = shalt.err (%p261_p13)  }
  0xab   :  { %188 = vsyncmov [#allocation2 + $0x5] }
  0xae   :  { %s189_s1 = vpop.sfrf %188 }
  0xaf   :  { %p262_p0 = scmp.ne.s32.totalorder %s189_s1, 0 }
  0xb1   :  { %193 = shalt.err (%p262_p0)  }
  0xb2   :  { %195 = vsyncmov [#allocation2 + $0x6] }
  0xb5   :  { %s196_s2 = vpop.sfrf %195 }
  0xb6   :  { %p263_p1 = scmp.ne.s32.totalorder %s196_s2, 0 }
  0xb8   :  { %200 = shalt.err (%p263_p1)  }
  0xb9   :  { %202 = vsyncmov [#allocation2 + $0x7] }
  0xbc   :  { %s203_s19 = vpop.sfrf %202 }
  0xbd   :  { %p264_p2 = scmp.ne.s32.totalorder %s203_s19, 0 }
  0xbf   :  { %207 = shalt.err (%p264_p2)  }

</bundles_post_ra>
